<compile_context>
chip_gen: v7x
topology: tpu7x:2x2x1
jax: 0.10.0
libtpu: 0.0.40
codegen_flags: <defaults>
</compile_context>

<pallas_src>
import jax
import jax.numpy as jnp
from jax.experimental import pallas as pl
from jax.experimental.pallas import tpu as pltpu


def _round_up(x: int, m: int) -> int:
    return (x + m - 1) // m * m


def _vmem_capacity_bytes() -> int:
    """Physical VMEM per TensorCore (fallback: 64 MiB, the v7x minimum)."""
    try:
        return int(pltpu.get_tpu_info().vmem_capacity_bytes)
    except Exception:
        return 64 << 20


def _choose_tb(B: int, tb_max: int) -> int:
    """Batch tile: multiple of 8, minimal batch padding, >=2 grid steps when
    B >= 16 (so dimension_semantics=('parallel',) can shard over both v7x
    TensorCores), larger tiles preferred to amortize per-step overhead."""
    b8 = _round_up(B, 8)
    cands = {8, 64, 128, 256, 512, b8,
             _round_up((b8 + 1) // 2, 8), _round_up((b8 + 3) // 4, 8)}
    cands = sorted(c for c in cands if 8 <= c <= max(8, tb_max))

    def score(tb):
        bp = _round_up(B, tb)
        steps = bp // tb
        single_step_penalty = 1 if (B >= 16 and steps < 2) else 0
        return (single_step_penalty, bp - B, -tb)

    return min(cands, key=score)


def _autoencoder_fwd_kernel(x_ref, we_ref, be_ref, wd_ref, bd_ref, out_ref):
    # Encoder: z = relu(x @ W_enc + b_enc).  bf16 MXU inputs, f32 accumulation.
    x = x_ref[...]                                              # (TB, Dp) bf16
    z = jnp.dot(x, we_ref[...], preferred_element_type=jnp.float32)
    # f32 elementwise path (safe on v5e: no bf16 VPU/EUP); hidden under HBM DMA.
    z = jnp.maximum(z + be_ref[...], 0.0)                       # (TB, Lp) f32
    # Decoder: recon = sigmoid(z @ W_dec + b_dec).
    r = jnp.dot(z.astype(jnp.bfloat16), wd_ref[...],
                preferred_element_type=jnp.float32)
    r = r + bd_ref[...]                                         # (1, Dp) broadcast
    out_ref[...] = jax.nn.sigmoid(r).astype(out_ref.dtype)      # bf16 store


def prepare_autoencoder_params(w_enc, b_enc, w_dec, b_dec):
    """Pad/cast the autoencoder parameters ONCE (hoisted out of forward).

    Weights -> lane-aligned bf16 (MXU inputs); biases stay f32 (added to the
    f32 accumulator in-kernel).  L is padded only to 128."""
    D, L = w_enc.shape
    Dp, Lp = _round_up(D, 128), _round_up(L, 128)
    we_p = jnp.pad(jnp.asarray(w_enc, jnp.float32).astype(jnp.bfloat16),
                   ((0, Dp - D), (0, Lp - L)))
    wd_p = jnp.pad(jnp.asarray(w_dec, jnp.float32).astype(jnp.bfloat16),
                   ((0, Lp - L), (0, Dp - D)))
    be_p = jnp.pad(jnp.asarray(b_enc, jnp.float32).reshape(1, L),
                   ((0, 0), (0, Lp - L)))
    bd_p = jnp.pad(jnp.asarray(b_dec, jnp.float32).reshape(1, D),
                   ((0, 0), (0, Dp - D)))
    return we_p, be_p, wd_p, bd_p


def mse_model_forward(x_nchw, params, *, tb_max=512, out_dtype=jnp.bfloat16):
    """MSEModel.forward: recon = sigmoid(relu(flatten(x) @ We + be) @ Wd + bd).

    Returns the reconstruction in `out_dtype` (bf16 by default; upcast outside
    only if the downstream loss needs f32)."""
    we_p, be_p, wd_p, bd_p = params
    B, C, H, W = x_nchw.shape
    D = C * H * W
    Dp, Lp = we_p.shape
    out_itemsize = jnp.dtype(out_dtype).itemsize
    vmem_cap = _vmem_capacity_bytes()

    # ---- batch tile selection (padding / megacore / VMEM aware) -----------
    TB = _choose_tb(B, tb_max)

    def footprint(tb):
        act = 2 * tb * Dp * 2 + 2 * tb * Dp * out_itemsize     # dbl-buffered x / out
        wts = 2 * (Dp * Lp + Lp * Dp) * 2                      # weights (2 bufs, bf16)
        bias = 2 * (Lp + Dp) * 4                               # biases (2 bufs, f32)
        live = tb * Lp * 4 + tb * Dp * 4                       # f32 z / pre-sigmoid temps
        return act + wts + bias + live

    while TB > 8 and footprint(TB) > vmem_cap // 2:
        TB = max(8, _round_up(TB // 2, 8))
    Bp = _round_up(B, TB)

    # ---- input: bf16 cast BEFORE any padding; skip padding when aligned ---
    x_flat = x_nchw.reshape(B, D).astype(jnp.bfloat16)
    if Bp > B or Dp > D:
        x_flat = jnp.pad(x_flat, ((0, Bp - B), (0, Dp - D)))

    grid = (Bp // TB,)
    flops = 4 * Bp * Dp * Lp                                   # two matmuls
    bytes_accessed = (Bp * Dp * 2                              # x (bf16 in)
                      + (Dp * Lp + Lp * Dp) * 2                # weights (bf16)
                      + (Lp + Dp) * 4                          # biases (f32)
                      + Bp * Dp * out_itemsize)                # recon (bf16 out)
    vmem_limit = int(min(max(1.5 * footprint(TB) + (4 << 20), 16 << 20),
                         0.9 * vmem_cap))

    const = lambda i: (0, 0)
    recon_p = pl.pallas_call(
        _autoencoder_fwd_kernel,
        out_shape=jax.ShapeDtypeStruct((Bp, Dp), out_dtype),
        grid=grid,
        in_specs=[
            pl.BlockSpec((TB, Dp), lambda i: (i, 0)),   # x tile: streamed per step
            pl.BlockSpec((Dp, Lp), const),              # W_enc: VMEM-resident
            pl.BlockSpec((1, Lp), const),               # b_enc: VMEM-resident
            pl.BlockSpec((Lp, Dp), const),              # W_dec: VMEM-resident
            pl.BlockSpec((1, Dp), const),               # b_dec: VMEM-resident
        ],
        out_specs=pl.BlockSpec((TB, Dp), lambda i: (i, 0)),
        compiler_params=pltpu.CompilerParams(
            dimension_semantics=("parallel",),          # shard batch over TCs
            vmem_limit_bytes=vmem_limit),
        cost_estimate=pl.CostEstimate(
            flops=flops, transcendentals=Bp * Dp,
            bytes_accessed=bytes_accessed),
    )(x_flat, we_p, be_p, wd_p, bd_p)

    # Padded rows/cols (sigmoid(0)=0.5 filler) must be sliced off; in the
    # aligned case skip the slice (it is an extra full-output HBM copy).
    recon = recon_p if (Bp == B and Dp == D) else recon_p[:B, :D]
    return recon.reshape(B, C, H, W)


def _reference_forward(x_nchw, w_enc, b_enc, w_dec, b_dec):
    B, C, H, W = x_nchw.shape
    x_flat = x_nchw.reshape(B, -1).astype(jnp.float32)
    z = jnp.maximum(x_flat @ w_enc + b_enc, 0.0)
    r = jax.nn.sigmoid(z @ w_dec + b_dec)
    return r.reshape(B, C, H, W)


if __name__ == "__main__":
    key = jax.random.PRNGKey(0)
    kx, ke, kbe, kd, kbd = jax.random.split(key, 5)

    # Small shapes consistent with an image autoencoder whose recon .squeeze()
    # is a 2D (H, W) map (as used by compute_loss's pin indexing).
    B, C, H, W = 2, 1, 16, 16
    D = C * H * W          # 256 (lane-aligned already)
    L = 32                 # latent dim (padded to 128 inside prepare_params)

    x = jax.random.normal(kx, (B, C, H, W), dtype=jnp.float32)
    w_enc = jax.random.normal(ke, (D, L), dtype=jnp.float32) * 0.05
    b_enc = jax.random.normal(kbe, (1, L), dtype=jnp.float32) * 0.01
    w_dec = jax.random.normal(kd, (L, D), dtype=jnp.float32) * 0.05
    b_dec = jax.random.normal(kbd, (1, D), dtype=jnp.float32) * 0.01

    # Weight padding/casting done once (not per forward call).
    params = prepare_autoencoder_params(w_enc, b_enc, w_dec, b_dec)

    recon = mse_model_forward(x, params)
    recon = jax.block_until_ready(recon)

    ref = _reference_forward(x, w_enc, b_enc, w_dec, b_dec)
    assert recon.shape == (B, C, H, W)
    assert recon.dtype == jnp.bfloat16
    # bf16 matmul inputs + bf16 output -> loosened tolerance vs f32 reference.
    assert jnp.allclose(recon.astype(jnp.float32), ref, atol=2e-2, rtol=2e-2), \
        "mismatch vs reference"

    # TODO(synk): compute_loss (gather at pin coords + MSE) is a training-time
    # utility, not part of forward(); left in plain JAX if ever needed.
    print("KERNEL_OK")
</pallas_src>

<mosaic_0001>
module attributes {stable_mosaic.version = 11 : i64} {
  func.func @_autoencoder_fwd_kernel(%arg0: i32, %arg1: memref<8x256xbf16, #tpu.memory_space<vmem>>, %arg2: memref<256x128xbf16, #tpu.memory_space<vmem>>, %arg3: memref<1x128xf32, #tpu.memory_space<vmem>>, %arg4: memref<128x256xbf16, #tpu.memory_space<vmem>>, %arg5: memref<1x256xf32, #tpu.memory_space<vmem>>, %arg6: memref<8x256xbf16, #tpu.memory_space<vmem>>) attributes {dimension_semantics = [#tpu.dimension_semantics<parallel>], iteration_bounds = array<i64: 1>, scalar_prefetch = 0 : i64, scratch_operands = 0 : i64, tpu.core_type = #tpu.core_type<tc>, window_params = [{transform_indices = @transform_0, window_bounds = array<i64: 8, 256>}, {pipeline_mode = #tpu.pipeline_mode<synchronous>, transform_indices = @transform_1, window_bounds = array<i64: 256, 128>}, {pipeline_mode = #tpu.pipeline_mode<synchronous>, transform_indices = @transform_2, window_bounds = array<i64: 1, 128>}, {pipeline_mode = #tpu.pipeline_mode<synchronous>, transform_indices = @transform_3, window_bounds = array<i64: 128, 256>}, {pipeline_mode = #tpu.pipeline_mode<synchronous>, transform_indices = @transform_4, window_bounds = array<i64: 1, 256>}, {transform_indices = @transform_5, window_bounds = array<i64: 8, 256>}]} {
    %c0 = arith.constant 0 : index
    %c0_0 = arith.constant 0 : index
    %0 = vector.load %arg1[%c0, %c0_0] : memref<8x256xbf16, #tpu.memory_space<vmem>>, vector<8x256xbf16>
    %c0_1 = arith.constant 0 : index
    %c0_2 = arith.constant 0 : index
    %1 = vector.load %arg2[%c0_1, %c0_2] : memref<256x128xbf16, #tpu.memory_space<vmem>>, vector<256x128xbf16>
    %cst = arith.constant dense<0.000000e+00> : vector<8x128xf32>
    %2 = tpu.matmul %0, %1, %cst {dimension_numbers = #tpu.dot_dimension_numbers<[1], [0], [0], [1], [0, 0, 1, 1], [], []>} : vector<8x256xbf16>, vector<256x128xbf16>, vector<8x128xf32> -> vector<8x128xf32>
    %c0_3 = arith.constant 0 : index
    %c0_4 = arith.constant 0 : index
    %3 = vector.load %arg3[%c0_3, %c0_4] : memref<1x128xf32, #tpu.memory_space<vmem>>, vector<1x128xf32>
    %4 = vector.broadcast %3 : vector<1x128xf32> to vector<8x128xf32>
    %5 = arith.addf %2, %4 : vector<8x128xf32>
    %cst_5 = arith.constant 0.000000e+00 : f32
    %6 = vector.broadcast %cst_5 : f32 to vector<8x128xf32>
    %7 = arith.maximumf %5, %6 : vector<8x128xf32>
    %8 = arith.truncf %7 : vector<8x128xf32> to vector<8x128xbf16>
    %c0_6 = arith.constant 0 : index
    %c0_7 = arith.constant 0 : index
    %9 = vector.load %arg4[%c0_6, %c0_7] : memref<128x256xbf16, #tpu.memory_space<vmem>>, vector<128x256xbf16>
    %cst_8 = arith.constant dense<0.000000e+00> : vector<8x256xf32>
    %10 = tpu.matmul %8, %9, %cst_8 {dimension_numbers = #tpu.dot_dimension_numbers<[1], [0], [0], [1], [0, 0, 1, 1], [], []>} : vector<8x128xbf16>, vector<128x256xbf16>, vector<8x256xf32> -> vector<8x256xf32>
    %c0_9 = arith.constant 0 : index
    %c0_10 = arith.constant 0 : index
    %11 = vector.load %arg5[%c0_9, %c0_10] : memref<1x256xf32, #tpu.memory_space<vmem>>, vector<1x256xf32>
    %12 = vector.broadcast %11 : vector<1x256xf32> to vector<8x256xf32>
    %13 = arith.addf %10, %12 : vector<8x256xf32>
    %14 = arith.negf %13 : vector<8x256xf32>
    %15 = math.exp %14 : vector<8x256xf32>
    %cst_11 = arith.constant 1.000000e+00 : f32
    %16 = vector.broadcast %cst_11 : f32 to vector<8x256xf32>
    %17 = arith.addf %16, %15 : vector<8x256xf32>
    %18 = arith.divf %16, %17 : vector<8x256xf32>
    %19 = arith.truncf %18 : vector<8x256xf32> to vector<8x256xbf16>
    %c0_12 = arith.constant 0 : index
    %c0_13 = arith.constant 0 : index
    %20 = vector.load %arg6[%c0_12, %c0_13] : memref<8x256xbf16, #tpu.memory_space<vmem>>, vector<8x256xbf16>
    tpu.vector_store %arg6[%c0_12, %c0_13], %19 {strides = array<i32>} : memref<8x256xbf16, #tpu.memory_space<vmem>>, vector<8x256xbf16>,
    return
  }
  func.func @transform_0(%arg0: i32) -> (i32, i32) {
    %c0_i32 = arith.constant 0 : i32
    %c0_i32_0 = arith.constant 0 : i32
    return %arg0, %c0_i32 : i32, i32
  }
  func.func @transform_1(%arg0: i32) -> (i32, i32) {
    %c0_i32 = arith.constant 0 : i32
    %c0_i32_0 = arith.constant 0 : i32
    %c0_i32_1 = arith.constant 0 : i32
    return %c0_i32, %c0_i32_0 : i32, i32
  }
  func.func @transform_2(%arg0: i32) -> (i32, i32) {
    %c0_i32 = arith.constant 0 : i32
    %c0_i32_0 = arith.constant 0 : i32
    %c0_i32_1 = arith.constant 0 : i32
    return %c0_i32, %c0_i32_0 : i32, i32
  }
  func.func @transform_3(%arg0: i32) -> (i32, i32) {
    %c0_i32 = arith.constant 0 : i32
    %c0_i32_0 = arith.constant 0 : i32
    %c0_i32_1 = arith.constant 0 : i32
    return %c0_i32, %c0_i32_0 : i32, i32
  }
  func.func @transform_4(%arg0: i32) -> (i32, i32) {
    %c0_i32 = arith.constant 0 : i32
    %c0_i32_0 = arith.constant 0 : i32
    %c0_i32_1 = arith.constant 0 : i32
    return %c0_i32, %c0_i32_0 : i32, i32
  }
  func.func @transform_5(%arg0: i32) -> (i32, i32) {
    %c0_i32 = arith.constant 0 : i32
    %c0_i32_0 = arith.constant 0 : i32
    return %arg0, %c0_i32 : i32, i32
  }
}

</mosaic_0001>

<bundles_post_ra>
// kernel: tpu_custom_call.1
= control target key start
LH: loop header
LB: loop body
LE: loop exit
PB: predicated region body
PF: predicated region fallthrough
CT: control target
= control target key end

     0   :  { %10 = vsyncpa [#allocation3], 0  ;;  %s739_s0 = inlined_call_operand.hbm [shape: bf16[8,256], index: 0, kind: input, shape index: {}]   ;;  %s740_s1 = inlined_call_operand.hbm [shape: bf16[256,128], index: 1, kind: input, shape index: {}]   ;;  %s741_s2 = inlined_call_operand.vmem [shape: f32[1,128], index: 2, kind: input, shape index: {}]   ;;  %s742_s3 = inlined_call_operand.hbm [shape: bf16[128,256], index: 3, kind: input, shape index: {}]   ;;  %s743_s4 = inlined_call_operand.vmem [shape: f32[1,256], index: 4, kind: input, shape index: {}]   ;;  %s744_s5 = inlined_call_operand.hbm [shape: bf16[8,256], index: 5, kind: output, shape index: {}]  }
   0x1   :  { %11 = vsyncpa [#allocation6], 0 }
   0x2   :  { %12 = vsyncpa [#allocation4], 0  ;;  %s646_s18 = smov [#allocation5]   ;;  %s552_s22 = scalar_lea.hbm %s740_s1, 2048 }
   0x3   :  { %s28_s19 = sshll.u32 %s646_s18, 4  ;;  %p553_p0 = scmp.ne.s32.totalorder %s740_s1, %s552_s22  ;;  %s29_s19 = int_to_ptr.vmem [resolvable:$true] %s28_s19 }
   0x4   :  { %p556_p1 = scmp.lt.u32.totalorder %s552_s22, %s740_s1 }
   0x6   :  { %p558_p2 = pnand %p556_p1, %p553_p0 }
   0x8   :  { %561 = shalt.err (!%p558_p2)
}
   0x9   :  { %s562_s27 = scalar_lea.vmem %s29_s19, 2048  ;;  %p567_p4 = scmp.lt.s32.totalorder %s29_s19, %s29_s19 }
   0xa   :  { %p563_p3 = scmp.ne.s32.totalorder %s29_s19, %s562_s27  ;;  %p568_p5 = scmp.lt.s32.totalorder %s562_s27, %s562_s27 }
   0xc   :  { %p569_p6 = por %p568_p5, %p567_p4 }
   0xe   :  { %p570_p7 = pnand %p569_p6, %p563_p3 }
  0x10   :  { %573 = shalt.err (!%p570_p7)
}
  0x11   :  { %s647_s28 = smov 64   ;;  %s648_s29 = smov 4  }
  0x12   :  { %34 = dma.hbm_to_vmem [thread:$0]  %s740_s1, 2048, %s29_s19, [#allocation6], %s647_s28, %s647_s28, %s648_s29  }
  0x13   :  { %s649_s7 = smov [#allocation2]   ;;  %s650_s9 = smov [#allocation7]  }
  0x14   :  { %s19_s8 = sshll.u32 %s649_s7, 4  ;;  %s42_s10 = sshll.u32 %s650_s9, 4  ;;  %s20_s8 = int_to_ptr.vmem [resolvable:$true] %s19_s8  ;;  %s43_s10 = int_to_ptr.vmem [resolvable:$true] %s42_s10 }
  0x15   :  { %s574_s13 = scalar_lea.hbm %s739_s0, 128 }
  0x16   :  { %p575_p8 = scmp.ne.s32.totalorder %s739_s0, %s574_s13  ;;  %p578_p9 = scmp.lt.u32.totalorder %s574_s13, %s739_s0 }
  0x18   :  { %p580_p10 = pnand %p578_p9, %p575_p8 }
  0x1a   :  { %583 = shalt.err (!%p580_p10)
}
  0x1b   :  { %s584_s1 = scalar_lea.vmem %s20_s8, 128  ;;  %p589_p12 = scmp.lt.s32.totalorder %s20_s8, %s20_s8 }
  0x1c   :  { %p585_p11 = scmp.ne.s32.totalorder %s20_s8, %s584_s1  ;;  %p590_p13 = scmp.lt.s32.totalorder %s584_s1, %s584_s1 }
  0x1e   :  { %p591_p0 = por %p590_p13, %p589_p12 }
  0x20   :  { %p592_p1 = pnand %p591_p0, %p585_p11 }
  0x22   :  { %595 = shalt.err (!%p592_p1)
}
  0x23   :  { %22 = dma.hbm_to_vmem [thread:$0]  %s739_s0, 128, %s20_s8, [#allocation3]  }
  0x24   :  { %s596_s22 = scalar_lea.hbm %s742_s3, 2048 }
  0x25   :  { %p597_p2 = scmp.ne.s32.totalorder %s742_s3, %s596_s22  ;;  %p600_p3 = scmp.lt.u32.totalorder %s596_s22, %s742_s3 }
  0x27   :  { %p602_p4 = pnand %p600_p3, %p597_p2 }
  0x29   :  { %605 = shalt.err (!%p602_p4)
}
  0x2a   :  { %s606_s27 = scalar_lea.vmem %s43_s10, 2048  ;;  %p611_p6 = scmp.lt.s32.totalorder %s43_s10, %s43_s10 }
  0x2b   :  { %p607_p5 = scmp.ne.s32.totalorder %s43_s10, %s606_s27  ;;  %p612_p7 = scmp.lt.s32.totalorder %s606_s27, %s606_s27 }
  0x2d   :  { %p613_p8 = por %p612_p7, %p611_p6 }
  0x2f   :  { %p614_p9 = pnand %p613_p8, %p607_p5 }
  0x31   :  { %617 = shalt.err (!%p614_p9)
}
  0x32   :  { %s651_s0 = smov 128   ;;  %s652_s28 = smov 8  }
  0x33   :  { %48 = dma.hbm_to_vmem [thread:$0]  %s742_s3, 2048, %s43_s10, [#allocation6], %s651_s0, %s651_s0, %s652_s28  }
  0x34   :  { %640 = dma.done.wait [#allocation3], 128  }
  0x35   :  { %641 = vsyncadd [#allocation3], 4294967168 }
  0x36   :  { %642 = dma.done.wait [#allocation6], 4096  }
  0x37   :  { %643 = vsyncadd [#allocation6], 4294963200  ;;  %v502_v0 = vld [vmem:[#allocation5 + $0x40] sm:$0xff]   ;;  %v504_v2 = vld [vmem:[#allocation5 + $0x48] sm:$0xff]   ;;  %v653_v35 = vmov 0   ;;  %v264_v45 = vlaneseq }
  0x38   :  { %v503_v1 = vld [vmem:[#allocation5] sm:$0xff]   ;;  %471 = vmatprep.subr.bf16.mxu0 %v502_v0  ;;  %v505_v3 = vld [vmem:[#allocation5 + $0x8] sm:$0xff]   ;;  %v506_v4 = vld [vmem:[#allocation5 + $0x50] sm:$0xff]   ;;  %386 = vmatprep.mubr.bf16.mxu1 %v653_v35 }
  0x39   :  { %472 = vmatpush3.bf16.msra.mxu0 %v503_v1  ;;  %v507_v5 = vld [vmem:[#allocation5 + $0x10] sm:$0xff]   ;;  %v508_v6 = vld [vmem:[#allocation5 + $0x58] sm:$0xff]   ;;  %v510_v8 = vld [vmem:[#allocation5 + $0x60] sm:$0xff]   ;;  %v265_v46 = vshrl.u32 %v264_v45, 7 }
  0x3a   :  { %473 = vmatprep.subr.bf16.mxu0 %v504_v2  ;;  %v509_v7 = vld [vmem:[#allocation5 + $0x18] sm:$0xff]   ;;  %v511_v9 = vld [vmem:[#allocation5 + $0x20] sm:$0xff]   ;;  %v512_v10 = vld [vmem:[#allocation5 + $0x68] sm:$0xff]  }
  0x3b   :  { %v61_v11 = vld [vmem:[#allocation2] sm:$0xff]  ;;  %v520_v13 = vld [vmem:[#allocation7 + $0x4] ss:$8 sps:$4 sm:$0xff]   ;;  %v522_v14 = vld [vmem:[#allocation7] ss:$8 sps:$4 sm:$0xff]   ;;  %v266_v47 = vsub.s32 0, %v265_v46 }
  0x3c   :  { %v434_v12 = vcombine.high %v61_v11, %v61_v11  ;;  %v523_v15 = vld [vmem:[#allocation7 + $0x14] ss:$8 sps:$4 sm:$0xff]   ;;  %v513_v16 = vld [vmem:[#allocation5 + $0x28] sm:$0xff]   ;;  %354 = vmatprep.subr.bf16.mxu1 %v520_v13  ;;  %v525_v18 = vld [vmem:[#allocation7 + $0x10] ss:$8 sps:$4 sm:$0xff]   ;;  %v433_v26 = vcombine.low %v61_v11, %v61_v11  ;;  %v270_v49 = vsub.s32 1, %v265_v46 }
  0x3d   :  { %474 = vmatpush3.bf16.msra.mxu0 %v505_v3  ;;  %v514_v17 = vld [vmem:[#allocation5 + $0x70] sm:$0xff]   ;;  %355 = vmatpush1.bf16.msra.mxu1 %v522_v14  ;;  %v526_v19 = vld [vmem:[#allocation7 + $0x24] ss:$8 sps:$4 sm:$0xff]   ;;  %v516_v21 = vld [vmem:[#allocation5 + $0x78] sm:$0xff]  }
  0x3e   :  { %475 = vmatprep.subr.bf16.mxu0 %v506_v4  ;;  %236 = vmatprep.mubr.bf16.mxu0 %v434_v12  ;;  %v515_v20 = vld [vmem:[#allocation5 + $0x30] sm:$0xff]   ;;  %v528_v22 = vld [vmem:[#allocation7 + $0x20] ss:$8 sps:$4 sm:$0xff]   ;;  %v517_v24 = vld [vmem:[#allocation5 + $0x38] sm:$0xff]  }
  0x3f   :  { %356 = vmatprep.subr.bf16.mxu1 %v523_v15  ;;  %v529_v23 = vld [vmem:[#allocation7 + $0x34] ss:$8 sps:$4 sm:$0xff]   ;;  %v531_v25 = vld [vmem:[#allocation7 + $0x30] ss:$8 sps:$4 sm:$0xff]   ;;  %v532_v27 = vld [vmem:[#allocation7 + $0x44] ss:$8 sps:$4 sm:$0xff]  }
  0x40   :  { %v534_v28 = vld [vmem:[#allocation7 + $0x40] ss:$8 sps:$4 sm:$0xff]   ;;  %v535_v29 = vld [vmem:[#allocation7 + $0x54] ss:$8 sps:$4 sm:$0xff]   ;;  %v537_v30 = vld [vmem:[#allocation7 + $0x50] ss:$8 sps:$4 sm:$0xff]  }
  0x41   :  { %476 = vmatpush3.bf16.msra.mxu0 %v507_v5  ;;  %357 = vmatpush1.bf16.msra.mxu1 %v525_v18  ;;  %v538_v31 = vld [vmem:[#allocation7 + $0x64] ss:$8 sps:$4 sm:$0xff]   ;;  %v540_v32 = vld [vmem:[#allocation7 + $0x60] ss:$8 sps:$4 sm:$0xff]   ;;  %v541_v33 = vld [vmem:[#allocation7 + $0x74] ss:$8 sps:$4 sm:$0xff]  }
  0x42   :  { %477 = vmatprep.subr.bf16.mxu0 %v508_v6  ;;  %358 = vmatprep.subr.bf16.mxu1 %v526_v19  ;;  %v543_v34 = vld [vmem:[#allocation7 + $0x70] ss:$8 sps:$4 sm:$0xff]  }
  0x43   :  { %v432_v37 = vld [vmem:[%s741_s2] ss:$0 sm:$0xff]  ;;  %s654_s2 = smov [#allocation8]  }
  0x44   :  { %v262_v48 = vld [vmem:[%s743_s4] sm:$0x3]  ;;  %s422_s4 = sshll.u32 %s654_s2, 4  ;;  %s423_s4 = int_to_ptr.vmem [resolvable:$true] %s422_s4 }
  0x45   :  { %478 = vmatpush3.bf16.msra.mxu0 %v509_v7  ;;  %359 = vmatpush1.bf16.msra.mxu1 %v528_v22  ;;  %v267_v50 = vrot.slane %v262_v48, %v266_v47  ;;  %v271_v51 = vrot.slane %v262_v48, %v270_v49  ;;  %s618_s9 = scalar_lea.vmem %s423_s4, 128  ;;  %p623_p11 = scmp.lt.s32.totalorder %s423_s4, %s423_s4 }
  0x46   :  { %479 = vmatprep.subr.bf16.mxu0 %v510_v8  ;;  %360 = vmatprep.subr.bf16.mxu1 %v529_v23  ;;  %p619_p10 = scmp.ne.s32.totalorder %s423_s4, %s618_s9  ;;  %p624_p12 = scmp.lt.s32.totalorder %s618_s9, %s618_s9 }
  0x48   :  { %p625_p13 = por %p624_p12, %p623_p11 }
  0x49   :  { %480 = vmatpush3.bf16.msra.mxu0 %v511_v9  ;;  %361 = vmatpush1.bf16.msra.mxu1 %v531_v25 }
  0x4a   :  { %481 = vmatprep.subr.bf16.mxu0 %v512_v10  ;;  %362 = vmatprep.subr.bf16.mxu1 %v532_v27  ;;  %p626_p0 = pnand %p625_p13, %p619_p10 }
  0x4d   :  { %482 = vmatpush3.bf16.msra.mxu0 %v513_v16  ;;  %363 = vmatpush1.bf16.msra.mxu1 %v534_v28 }
  0x4e   :  { %483 = vmatprep.subr.bf16.mxu0 %v514_v17  ;;  %364 = vmatprep.subr.bf16.mxu1 %v535_v29 }
  0x51   :  { %484 = vmatpush3.bf16.msra.mxu0 %v515_v20  ;;  %365 = vmatpush1.bf16.msra.mxu1 %v537_v30 }
  0x52   :  { %485 = vmatprep.subr.bf16.mxu0 %v516_v21  ;;  %366 = vmatprep.subr.bf16.mxu1 %v538_v31 }
  0x55   :  { %486 = vmatpush3.bf16.msra.mxu0 %v517_v24  ;;  %367 = vmatpush1.bf16.msra.mxu1 %v540_v32 }
  0x56   :  { %368 = vmatprep.subr.bf16.mxu1 %v541_v33 }
  0x58   :  { %237 = vmatmul.mubr.bf16.vlgmr.msra.gmra.mrb[0].mxu0 %v433_v26 }
  0x59   :  { %369 = vmatpush1.bf16.msra.mxu1 %v543_v34 }
 0x12b   :  { %v487_v36 = vpop.f32.mrb[0].mxu0 }
 0x12c   :  { %v488_v38 = vpop.f32.mrb[1].mxu0 }
 0x12d   :  { %v489_v39 = vadd.f32 %v488_v38, %v487_v36  ;;  %v490_v40 = vpop.f32.mrb[2].mxu0 }
 0x12e   :  { %v491_v41 = vpop.f32.mrb[3].mxu0 }
 0x12f   :  { %v239_v42 = vadd.f32 %v489_v39, %v432_v37 }
 0x131   :  { %v244_v43 = vmax.f32 %v239_v42, 0.0 }
 0x133   :  { %v245_v44 = vpack.c.bf16 %v244_v43, %v244_v43 }
 0x135   :  { %387 = vmatmul.mubr.bf16.vlgmr.msra.gmra.mrb[0].mxu1 %v245_v44 }
 0x208   :  { %v388_v52 = vpop.f32.mrb[0].mxu1 }
 0x209   :  { %v389_v53 = vadd.f32 %v388_v52, %v267_v50  ;;  %v390_v54 = vpop.f32.mrb[1].mxu1 }
 0x20a   :  { %v391_v55 = vadd.f32 %v390_v54, %v271_v51  ;;  %v392_v56 = vpop.f32.mrb[2].mxu1 }
 0x20b   :  { %v467_v57 = vmul.f32 -1.442695, %v389_v53  ;;  %v393_v58 = vpop.f32.mrb[3].mxu1 }
 0x20c   :  { %v468_v59 = vmul.f32 -1.442695, %v391_v55 }
 0x20d   :  { %544 = vpow2.f32 %v467_v57 }
 0x20e   :  { %546 = vpow2.f32 %v468_v59 }
 0x217   :  { %v545_v60 = vpop.eup %544 }
 0x218   :  { %v547_v61 = vpop.eup %546  ;;  %v401_v62 = vadd.f32 1.0, %v545_v60 }
 0x219   :  { %v402_v63 = vadd.f32 1.0, %v547_v61 }
 0x21a   :  { %548 = vrcp.f32 %v401_v62 }
 0x21b   :  { %550 = vrcp.f32 %v402_v63 }
 0x224   :  { %v549_v0 = vpop.eup %548 }
 0x225   :  { %v551_v1 = vpop.eup %550 }
 0x226   :  { %v470_v2 = vpack.c.bf16 %v551_v1, %v549_v0 }
 0x228   :  { %415 = vst [vmem:[#allocation8] sm:$0xff] %v470_v2 }
 0x229   :  { %629 = shalt.err (!%p626_p0)
}
 0x22a   :  { %s630_s12 = scalar_lea.hbm %s744_s5, 128 }
 0x22b   :  { %p631_p1 = scmp.ne.s32.totalorder %s744_s5, %s630_s12  ;;  %p634_p2 = scmp.lt.u32.totalorder %s630_s12, %s744_s5 }
 0x22d   :  { %p636_p3 = pnand %p634_p2, %p631_p1 }
 0x22f   :  { %639 = shalt.err (!%p636_p3)
}
 0x230   :  { %425 = dma.vmem_to_hbm [thread:$0]  %s423_s4, 128, %s744_s5, [#allocation4]  }
 0x231   :  { %644 = dma.done.wait [#allocation4], 128  }
 0x232   :  { %645 = vsyncadd [#allocation4], 4294967168 }
 0x233   :  { %429 = vsyncpa [#allocation3], 1 }
 0x234   :  { %430 = vsyncpa [#allocation6], 1 }
 0x235   :  { %431 = vsyncpa [#allocation4], 1 }

</bundles_post_ra>
